<compile_context>
chip_gen: v7x
topology: tpu7x:2x2x1
jax: 0.10.0
libtpu: 0.0.40
codegen_flags: <defaults>
</compile_context>

<pallas_src>
import functools

import jax
import jax.numpy as jnp
from jax import lax
from jax.experimental import pallas as pl
from jax.experimental.pallas import tpu as pltpu

_LANE = 128
_SUBLANE = 8
_ALIGN = _SUBLANE * _LANE                 # 1024: kernel consumes this-aligned prefix
_TARGET_BLOCK_BYTES = 4 * 1024 * 1024     # ~4 MiB per input per block
_MIN_SPLIT_ROWS = 512                     # only split across 2 TCs above this
_VMEM_LIMIT_BYTES = 32 * 1024 * 1024      # 2 inputs x 2 bufs x 4 MiB = 16 MiB << 32 MiB
_SLAB_UNROLL = 2
_THRESH = 0.05


def _cdiv(a, b):
    return (a + b - 1) // b


def _round_up(x, m):
    return ((x + m - 1) // m) * m


def _pick_slab(tile_rows):
    # Largest of {64,32,16,8} rows dividing the tile (tile_rows is a multiple of 8).
    for s in (64, 32, 16, 8):
        if tile_rows % s == 0:
            return s
    return tile_rows  # unreachable


def _plan_tiling(rows, itemsize):
    """Choose (num_cores, tiles_per_core, tile_rows) for a (rows, 128) slab.

    Invariants: rows % 8 == 0; returned tile_rows % 8 == 0; every block start
    (= block_index * tile_rows) is strictly inside [0, rows) -> no fully-OOB DMA.
    """
    budget_rows = (_TARGET_BLOCK_BYTES // (_LANE * itemsize)) // _SUBLANE * _SUBLANE
    budget_rows = max(_SUBLANE, budget_rows)
    tile_rows = min(budget_rows, rows)
    n_tiles = _cdiv(rows, tile_rows)
    nc, ti = 1, n_tiles
    if rows >= _MIN_SPLIT_ROWS:
        ti2 = _cdiv(n_tiles, 2)
        nt2 = 2 * ti2
        if nt2 == n_tiles:
            nc, ti = 2, ti2
        else:
            # Re-balance so 2*ti2 equal tiles cover the rows without any tile
            # starting past the end of the array.
            tr2 = _round_up(_cdiv(rows, nt2), _SUBLANE)
            if (nt2 - 1) * tr2 < rows:
                nc, ti, tile_rows = 2, ti2, tr2
    return nc, ti, tile_rows


def _lbhinge_kernel(pred_ref, gt_ref, o_ref, acc_ref, *, slab_rows, n_slabs,
                    last_n_slabs, last_valid_rows, mask_needed):
    i = pl.program_id(1)

    @pl.when(i == 0)
    def _():
        acc_ref[...] = jnp.zeros_like(acc_ref)

    def accumulate(num_slabs, row_limit):
        # Sum of squared hinge errors over `num_slabs` slabs of this tile,
        # folded onto an (8, 128) vreg-shaped accumulator (pure VPU adds).
        if row_limit is not None:
            base_rid = lax.broadcasted_iota(jnp.int32, (slab_rows, _LANE), 0)

        def slab_body(s, acc):
            r0 = pl.multiple_of(s * slab_rows, slab_rows)
            p = pred_ref[pl.ds(r0, slab_rows), :].astype(jnp.float32)
            g = gt_ref[pl.ds(r0, slab_rows), :].astype(jnp.float32)
            pos = g > _THRESH
            pred_new = jnp.where(pos, p, jnp.maximum(p, 0.0))
            diff = pred_new - jnp.where(pos, g, 0.0)
            sq = diff * diff
            if row_limit is not None:
                # Select (not multiply) so garbage NaN/Inf in unread rows is dropped.
                sq = jnp.where(base_rid + r0 < row_limit, sq, 0.0)
            return acc + jnp.sum(sq.reshape(-1, _SUBLANE, _LANE), axis=0)

        init = jnp.zeros((_SUBLANE, _LANE), jnp.float32)
        unroll = max(1, min(_SLAB_UNROLL, num_slabs))
        acc = lax.fori_loop(0, num_slabs, slab_body, init, unroll=unroll)
        acc_ref[...] += acc

    if mask_needed:
        # Only the globally-last tile is ragged; gate the masked path so every
        # other grid step keeps the minimal VALU count.
        is_last_tile = jnp.logical_and(
            pl.program_id(0) == pl.num_programs(0) - 1,
            i == pl.num_programs(1) - 1)

        @pl.when(is_last_tile)
        def _():
            accumulate(last_n_slabs, last_valid_rows)

        @pl.when(jnp.logical_not(is_last_tile))
        def _():
            accumulate(n_slabs, None)
    else:
        accumulate(n_slabs, None)

    @pl.when(i == pl.num_programs(1) - 1)
    def _():
        # Per-core raw partial sum; mean scaling happens in the wrapper.
        o_ref[0, 0] = jnp.sum(acc_ref[...])


def _hinge_sq(p, g):
    pos = g > _THRESH
    pred_new = jnp.where(pos, p, jnp.maximum(p, 0.0))
    diff = pred_new - jnp.where(pos, g, 0.0)
    return diff * diff


def lbhinge_v2_loss(pred, gt, threshold=None, return_per_sequence=False):
    """Pallas TPU implementation of LBHingev2.forward.

    `threshold` / `return_per_sequence` are unused by the reference forward.
    """
    assert pred.ndim == 4 and gt.ndim == 4
    assert pred.shape == gt.shape

    total = 1
    for d in pred.shape:
        total *= d

    p_flat = pred.reshape(-1)
    g_flat = gt.reshape(-1)

    aligned = (total // _ALIGN) * _ALIGN
    rows = aligned // _LANE
    itemsize = max(jnp.dtype(pred.dtype).itemsize, jnp.dtype(gt.dtype).itemsize)

    main_sum = jnp.float32(0.0)
    if rows > 0:
        nc, ti, tile_rows = _plan_tiling(rows, itemsize)
        slab_rows = _pick_slab(tile_rows)
        n_slabs = tile_rows // slab_rows
        n_tiles = nc * ti
        last_valid = rows - (n_tiles - 1) * tile_rows
        mask_needed = (n_tiles * tile_rows) != rows
        last_n_slabs = _cdiv(last_valid, slab_rows)

        # Free bitcast reshape when total is 1024-aligned; otherwise slice the
        # aligned prefix (the <1024-element remainder is folded in below).
        p_main = p_flat if aligned == total else p_flat[:aligned]
        g_main = g_flat if aligned == total else g_flat[:aligned]
        p2 = p_main.reshape(rows, _LANE)
        g2 = g_main.reshape(rows, _LANE)

        kernel = functools.partial(
            _lbhinge_kernel,
            slab_rows=slab_rows,
            n_slabs=n_slabs,
            last_n_slabs=last_n_slabs,
            last_valid_rows=last_valid,
            mask_needed=mask_needed,
        )

        partials = pl.pallas_call(
            kernel,
            out_shape=jax.ShapeDtypeStruct((nc, 1), jnp.float32),
            grid_spec=pltpu.PrefetchScalarGridSpec(
                num_scalar_prefetch=0,
                grid=(nc, ti),
                in_specs=[
                    pl.BlockSpec((tile_rows, _LANE), lambda c, i: (c * ti + i, 0)),
                    pl.BlockSpec((tile_rows, _LANE), lambda c, i: (c * ti + i, 0)),
                ],
                out_specs=pl.BlockSpec(
                    (1, 1), lambda c, i: (c, 0), memory_space=pltpu.SMEM),
                scratch_shapes=[pltpu.VMEM((_SUBLANE, _LANE), jnp.float32)],
            ),
            compiler_params=pltpu.CompilerParams(
                dimension_semantics=("parallel", "arbitrary"),
                vmem_limit_bytes=_VMEM_LIMIT_BYTES,
            ),
            cost_estimate=pl.CostEstimate(
                flops=7 * aligned,
                transcendentals=0,
                bytes_accessed=2 * aligned * itemsize + nc * 4,
            ),
        )(p2, g2)
        main_sum = jnp.sum(partials)

    if aligned != total:
        # <1024-element unaligned remainder: tiny plain-JAX sum (no full-array pad).
        p_t = p_flat[aligned:].astype(jnp.float32)
        g_t = g_flat[aligned:].astype(jnp.float32)
        main_sum = main_sum + jnp.sum(_hinge_sq(p_t, g_t))

    # mse_loss(reduction='mean') over the original element count.
    return main_sum * jnp.float32(1.0 / float(total))


def _reference(pred, gt):
    pred = pred.astype(jnp.float32)
    gt = gt.astype(jnp.float32)
    pos_mask = (gt > 0.05).astype(jnp.float32)
    neg_mask = 1.0 - pos_mask
    pred_relu_mask = (pred > 0.0).astype(jnp.float32)
    pred_new = neg_mask * pred_relu_mask * pred + pos_mask * pred
    return jnp.mean((pred_new - gt * pos_mask) ** 2)


def _check(pred, gt, rtol=1e-5, atol=1e-6):
    loss = jax.block_until_ready(lbhinge_v2_loss(pred, gt))
    ref = jax.block_until_ready(_reference(pred, gt))
    assert jnp.allclose(loss, ref, rtol=rtol, atol=atol), (loss, ref)


if __name__ == "__main__":
    root = jax.random.PRNGKey(0)
    keys = jax.random.split(root, 10)

    # 1) Small 4-D shape consistent with the module's forward (pred.dim()==4).
    shape = (2, 4, 16, 16)                      # total=2048, single small tile
    pred = jax.random.normal(keys[0], shape, dtype=jnp.float32)
    gt = jax.random.uniform(keys[1], shape, dtype=jnp.float32)
    _check(pred, gt)

    # 2) Larger shape: 1024-aligned, exercises the 2-core split + slab loop.
    shape2 = (2, 8, 96, 144)                    # rows=1728 -> nc=2, no tail mask
    pred2 = jax.random.normal(keys[2], shape2, dtype=jnp.float32)
    gt2 = jax.random.uniform(keys[3], shape2, dtype=jnp.float32)
    _check(pred2, gt2)

    # 3) 2-core split with a ragged (masked) last tile.
    shape3 = (2, 4, 217, 128)                   # rows=1736 -> nc=2, masked tail
    pred3 = jax.random.normal(keys[4], shape3, dtype=jnp.float32)
    gt3 = jax.random.uniform(keys[5], shape3, dtype=jnp.float32)
    _check(pred3, gt3)

    # 4) Unaligned total: kernel covers the 1024-aligned prefix, wrapper folds tail.
    shape4 = (2, 3, 17, 19)                     # total=1938 -> rows=8, tail=914
    pred4 = jax.random.normal(keys[6], shape4, dtype=jnp.float32)
    gt4 = jax.random.uniform(keys[7], shape4, dtype=jnp.float32)
    _check(pred4, gt4)

    # 5) bf16 pass-through (cast to f32 happens inside the kernel).
    _check(pred2.astype(jnp.bfloat16), gt2.astype(jnp.bfloat16))

    print("KERNEL_OK")
</pallas_src>

<mosaic_0001>
module attributes {stable_mosaic.version = 11 : i64} {
  func.func @_lbhinge_kernel(%arg0: i32, %arg1: i32, %arg2: memref<16x128xf32, #tpu.memory_space<vmem>>, %arg3: memref<16x128xf32, #tpu.memory_space<vmem>>, %arg4: memref<1x1xf32, #tpu.memory_space<smem>>, %arg5: memref<8x128xf32, #tpu.memory_space<vmem>>) attributes {dimension_semantics = [#tpu.dimension_semantics<parallel>, #tpu.dimension_semantics<arbitrary>], iteration_bounds = array<i64: 1, 1>, scalar_prefetch = 0 : i64, scratch_operands = 1 : i64, tpu.core_type = #tpu.core_type<tc>, window_params = [{transform_indices = @transform_0, window_bounds = array<i64: 16, 128>}, {transform_indices = @transform_1, window_bounds = array<i64: 16, 128>}, {transform_indices = @transform_2, window_bounds = array<i64: 1, 1>}]} {
    %c0_i32 = arith.constant 0 : i32
    %0 = arith.cmpi eq, %arg1, %c0_i32 : i32
    %1 = arith.extui %0 : i1 to i32
    %c0_i32_0 = arith.constant 0 : i32
    %2 = arith.cmpi ne, %1, %c0_i32_0 : i32
    scf.if %2 {
      %cst_13 = arith.constant 0.000000e+00 : f32
      %28 = vector.broadcast %cst_13 : f32 to vector<8x128xf32>
      %c0_14 = arith.constant 0 : index
      %c0_15 = arith.constant 0 : index
      %29 = vector.load %arg5[%c0_14, %c0_15] : memref<8x128xf32, #tpu.memory_space<vmem>>, vector<8x128xf32>
      tpu.vector_store %arg5[%c0_14, %c0_15], %28 {strides = array<i32>} : memref<8x128xf32, #tpu.memory_space<vmem>>, vector<8x128xf32>,
    } else {
    }
    %cst = arith.constant 0.000000e+00 : f32
    %3 = vector.broadcast %cst : f32 to vector<8x128xf32>
    %c0_i32_1 = arith.constant 0 : i32
    %c16_i32 = arith.constant 16 : i32
    %4 = arith.muli %c0_i32_1, %c16_i32 : i32
    %5 = tpu.assume_multiple %4, 16 : i32
    %6 = arith.index_cast %5 : i32 to index
    %c0 = arith.constant 0 : index
    %7 = vector.load %arg2[%6, %c0] : memref<16x128xf32, #tpu.memory_space<vmem>>, vector<16x128xf32>
    %8 = arith.index_cast %5 : i32 to index
    %c0_2 = arith.constant 0 : index
    %9 = vector.load %arg3[%8, %c0_2] : memref<16x128xf32, #tpu.memory_space<vmem>>, vector<16x128xf32>
    %cst_3 = arith.constant 5.000000e-02 : f32
    %10 = vector.broadcast %cst_3 : f32 to vector<16x128xf32>
    %11 = arith.cmpf ogt, %9, %10 : vector<16x128xf32>
    %cst_4 = arith.constant 0.000000e+00 : f32
    %12 = vector.broadcast %cst_4 : f32 to vector<16x128xf32>
    %13 = arith.maximumf %7, %12 : vector<16x128xf32>
    %14 = arith.select %11, %7, %13 : vector<16x128xi1>, vector<16x128xf32>
    %cst_5 = arith.constant 0.000000e+00 : f32
    %15 = vector.broadcast %cst_5 : f32 to vector<16x128xf32>
    %16 = arith.select %11, %9, %15 : vector<16x128xi1>, vector<16x128xf32>
    %17 = arith.subf %14, %16 : vector<16x128xf32>
    %18 = arith.mulf %17, %17 : vector<16x128xf32>
    %19 = vector.shape_cast %18 : vector<16x128xf32> to vector<2x8x128xf32>
    %cst_6 = arith.constant dense<0.000000e+00> : vector<8x128xf32>
    %20 = vector.multi_reduction <add>, %19, %cst_6 [0] : vector<2x8x128xf32> to vector<8x128xf32>
    %21 = arith.addf %3, %20 : vector<8x128xf32>
    %c1_i32 = arith.constant 1 : i32
    %c0_7 = arith.constant 0 : index
    %c0_8 = arith.constant 0 : index
    %22 = vector.load %arg5[%c0_7, %c0_8] : memref<8x128xf32, #tpu.memory_space<vmem>>, vector<8x128xf32>
    %23 = arith.addf %22, %21 : vector<8x128xf32>
    %c0_9 = arith.constant 0 : index
    %c0_10 = arith.constant 0 : index
    %24 = vector.load %arg5[%c0_9, %c0_10] : memref<8x128xf32, #tpu.memory_space<vmem>>, vector<8x128xf32>
    tpu.vector_store %arg5[%c0_9, %c0_10], %23 {strides = array<i32>} : memref<8x128xf32, #tpu.memory_space<vmem>>, vector<8x128xf32>,
    %c0_i32_11 = arith.constant 0 : i32
    %25 = arith.cmpi eq, %arg1, %c0_i32_11 : i32
    %26 = arith.extui %25 : i1 to i32
    %c0_i32_12 = arith.constant 0 : i32
    %27 = arith.cmpi ne, %26, %c0_i32_12 : i32
    scf.if %27 {
      %c0_13 = arith.constant 0 : index
      %c0_14 = arith.constant 0 : index
      %28 = vector.load %arg5[%c0_13, %c0_14] : memref<8x128xf32, #tpu.memory_space<vmem>>, vector<8x128xf32>
      %29 = vector.shape_cast %28 : vector<8x128xf32> to vector<1x8x128xf32>
      %cst_15 = arith.constant dense<0.000000e+00> : vector<1xf32>
      %30 = vector.multi_reduction <add>, %29, %cst_15 [1, 2] : vector<1x8x128xf32> to vector<1xf32>
      %31 = vector.shape_cast %30 : vector<1xf32> to vector<1x1x1xf32>
      %32 = vector.extract %31[0, 0, 0] : f32 from vector<1x1x1xf32>
      %c0_16 = arith.constant 0 : index
      %c0_17 = arith.constant 0 : index
      %33 = memref.load %arg4[%c0_16, %c0_17] : memref<1x1xf32, #tpu.memory_space<smem>>
      memref.store %32, %arg4[%c0_16, %c0_17] : memref<1x1xf32, #tpu.memory_space<smem>>
    } else {
    }
    return
  }
  func.func @transform_0(%arg0: i32, %arg1: i32) -> (i32, i32) {
    %c1_i32 = arith.constant 1 : i32
    %0 = arith.muli %arg0, %c1_i32 : i32
    %1 = arith.addi %0, %arg1 : i32
    %c0_i32 = arith.constant 0 : i32
    %c0_i32_0 = arith.constant 0 : i32
    return %1, %c0_i32 : i32, i32
  }
  func.func @transform_1(%arg0: i32, %arg1: i32) -> (i32, i32) {
    %c1_i32 = arith.constant 1 : i32
    %0 = arith.muli %arg0, %c1_i32 : i32
    %1 = arith.addi %0, %arg1 : i32
    %c0_i32 = arith.constant 0 : i32
    %c0_i32_0 = arith.constant 0 : i32
    return %1, %c0_i32 : i32, i32
  }
  func.func @transform_2(%arg0: i32, %arg1: i32) -> (i32, i32) {
    %c0_i32 = arith.constant 0 : i32
    %c0_i32_0 = arith.constant 0 : i32
    return %arg0, %c0_i32 : i32, i32
  }
}

</mosaic_0001>

<bundles_post_ra>
// kernel: tpu_custom_call.1
= control target key start
LH: loop header
LB: loop body
LE: loop exit
PB: predicated region body
PF: predicated region fallthrough
CT: control target
= control target key end

     0   :  { %7 = vsyncpa [#allocation4], 0  ;;  %s231_s0 = inlined_call_operand.hbm [shape: f32[16,128], index: 0, kind: input, shape index: {}]   ;;  %s232_s1 = inlined_call_operand.hbm [shape: f32[16,128], index: 1, kind: input, shape index: {}]   ;;  %s233_s2 = inlined_call_operand.hbm [shape: f32[1,1], index: 2, kind: output, shape index: {}]  }
   0x1   :  { %8 = vsyncpa [#allocation7], 0 }
   0x2   :  { %9 = vsyncpa [#allocation5], 0  ;;  %s175_s9 = smov [#allocation3]   ;;  %s115_s13 = scalar_lea.hbm %s231_s0, 256 }
   0x3   :  { %s19_s10 = sshll.u32 %s175_s9, 4  ;;  %p116_p0 = scmp.ne.s32.totalorder %s231_s0, %s115_s13  ;;  %s20_s10 = int_to_ptr.vmem [resolvable:$true] %s19_s10 }
   0x4   :  { %p119_p1 = scmp.lt.u32.totalorder %s115_s13, %s231_s0 }
   0x6   :  { %p121_p2 = pnand %p119_p1, %p116_p0 }
   0x8   :  { %124 = shalt.err (!%p121_p2)
}
   0x9   :  { %s125_s18 = scalar_lea.vmem %s20_s10, 256  ;;  %p130_p4 = scmp.lt.s32.totalorder %s20_s10, %s20_s10 }
   0xa   :  { %p126_p3 = scmp.ne.s32.totalorder %s20_s10, %s125_s18  ;;  %p131_p5 = scmp.lt.s32.totalorder %s125_s18, %s125_s18 }
   0xc   :  { %p132_p6 = por %p131_p5, %p130_p4 }
   0xe   :  { %p133_p7 = pnand %p132_p6, %p126_p3 }
  0x10   :  { %136 = shalt.err (!%p133_p7)
}
  0x11   :  { %s176_s19 = smov 128   ;;  %s177_s20 = smov 8  }
  0x12   :  { %25 = dma.hbm_to_vmem [thread:$0]  %s231_s0, 256, %s20_s10, [#allocation4], %s176_s19, %s176_s19, %s177_s20  }
  0x13   :  { %s178_s23 = smov [#allocation6]   ;;  %s137_s27 = scalar_lea.hbm %s232_s1, 256 }
  0x14   :  { %s35_s24 = sshll.u32 %s178_s23, 4  ;;  %p138_p8 = scmp.ne.s32.totalorder %s232_s1, %s137_s27  ;;  %s36_s24 = int_to_ptr.vmem [resolvable:$true] %s35_s24 }
  0x15   :  { %p141_p9 = scmp.lt.u32.totalorder %s137_s27, %s232_s1 }
  0x17   :  { %p143_p10 = pnand %p141_p9, %p138_p8 }
  0x19   :  { %146 = shalt.err (!%p143_p10)
}
  0x1a   :  { %s147_s4 = scalar_lea.vmem %s36_s24, 256  ;;  %p152_p12 = scmp.lt.s32.totalorder %s36_s24, %s36_s24 }
  0x1b   :  { %p148_p11 = scmp.ne.s32.totalorder %s36_s24, %s147_s4  ;;  %p153_p13 = scmp.lt.s32.totalorder %s147_s4, %s147_s4 }
  0x1d   :  { %p154_p0 = por %p153_p13, %p152_p12 }
  0x1f   :  { %p155_p1 = pnand %p154_p0, %p148_p11 }
  0x21   :  { %158 = shalt.err (!%p155_p1)
}
  0x22   :  { %41 = dma.hbm_to_vmem [thread:$0]  %s232_s1, 256, %s36_s24, [#allocation7], %s176_s19, %s176_s19, %s177_s20  }
  0x23   :  { %169 = dma.done.wait [#allocation4], 256  }
  0x24   :  { %170 = vsyncadd [#allocation4], 4294967040 }
  0x25   :  { %171 = dma.done.wait [#allocation7], 256  }
  0x26   :  { %172 = vsyncadd [#allocation7], 4294967040  ;;  %v57_v0 = vld [vmem:[#allocation3] sm:$0xff]  ;;  %v58_v1 = vld [vmem:[#allocation3 + $0x8] sm:$0xff]  ;;  %s159_s8 = scalar_lea.hbm %s233_s2, 16 }
  0x27   :  { %v59_v2 = vld [vmem:[#allocation6] sm:$0xff]  ;;  %v60_v3 = vld [vmem:[#allocation6 + $0x8] sm:$0xff]  ;;  %v63_v4 = vmax.f32 %v57_v0, 0.0  ;;  %v64_v5 = vmax.f32 %v58_v1, 0.0  ;;  %p160_p2 = scmp.ne.s32.totalorder %s233_s2, %s159_s8  ;;  %p163_p3 = scmp.lt.u32.totalorder %s159_s8, %s233_s2 }
  0x28   :  { %vm61_vm0 = vcmp.gt.f32.partialorder %v59_v2, 0.05  ;;  %vm62_vm1 = vcmp.gt.f32.partialorder %v60_v3, 0.05 }
  0x29   :  { %v67_v6 = vsel %vm61_vm0, %v59_v2, 0.0  ;;  %v65_v7 = vsel %vm61_vm0, %v57_v0, %v63_v4  ;;  %v66_v8 = vsel %vm62_vm1, %v58_v1, %v64_v5  ;;  %v68_v9 = vsel %vm62_vm1, %v60_v3, 0.0  ;;  %p165_p4 = pnand %p163_p3, %p160_p2 }
  0x2a   :  { %v69_v10 = vsub.f32 %v65_v7, %v67_v6  ;;  %v70_v11 = vsub.f32 %v66_v8, %v68_v9 }
  0x2c   :  { %v71_v12 = vmul.f32 %v69_v10, %v69_v10  ;;  %v72_v13 = vmul.f32 %v70_v11, %v70_v11 }
  0x2e   :  { %v73_v14 = vadd.f32 %v72_v13, %v71_v12 }
  0x30   :  { %82 = vadd.xlane.f32.xlu0 %v73_v14 }
  0xbd   :  { %v83_v15 = vpop.xlane.xlu0 %82 }
  0xbe   :  { %v84_v16 = vrot.slane %v83_v15, 4 }
  0xc0   :  { %v85_v17 = vadd.f32 %v84_v16, %v83_v15 }
  0xc2   :  { %v86_v18 = vrot.slane %v85_v17, 2 }
  0xc4   :  { %v87_v19 = vadd.f32 %v86_v18, %v85_v17 }
  0xc6   :  { %v88_v20 = vrot.slane %v87_v19, 1 }
  0xc8   :  { %v89_v21 = vadd.f32 %v88_v20, %v87_v19 }
  0xca   :  { %108 = vpush %v89_v21 }
  0xfb   :  { %s109_s1 = spop %108 }
  0xfc   :  { %92 = sst [smem:[#allocation8]] %s109_s1 }
  0xfd   :  { %168 = shalt.err (!%p165_p4)
}
  0xfe   :  { %s179_s13 = smov [#allocation8]  }
  0xff   :  { %100 = dma.smem_to_hbm %s179_s13, 16, %s233_s2, [#allocation5]  }
 0x100   :  { %173 = dma.done.wait [#allocation5], 16  }
 0x101   :  { %174 = vsyncadd [#allocation5], 4294967280 }
 0x102   :  { %104 = sfence }
 0x103   :  { %105 = vsyncpa [#allocation4], 1 }
 0x104   :  { %106 = vsyncpa [#allocation7], 1 }
 0x105   :  { %107 = vsyncpa [#allocation5], 1 }

</bundles_post_ra>
